<compile_context>
chip_gen: v7x
topology: tpu7x:2x2x1
jax: 0.10.0
libtpu: 0.0.40
codegen_flags: <defaults>
</compile_context>

<pallas_src>
import math

import jax
import jax.numpy as jnp
from jax.experimental import pallas as pl
from jax.experimental.pallas import tpu as pltpu


def _fake_quant_rows(w, qmax):
    """Unsigned uniform fake-quant per row (last axis), matching UniformQuantize
    with flatten_dims=None, reduce_dim=None, signed=False, dequantize=True."""
    mn = jnp.min(w, axis=-1, keepdims=True)
    mx = jnp.max(w, axis=-1, keepdims=True)
    scale = jnp.maximum((mx - mn) / qmax, 1e-8)
    return jnp.round(jnp.clip((w - mn) / scale, 0.0, qmax)) * scale + mn


def _pick_tile(n, target):
    """Largest divisor of n that is <= target (prefer multiples of 8)."""
    if n <= target:
        return n
    for t in range(target, 0, -1):
        if n % t == 0 and t % 8 == 0:
            return t
    return n


def _make_proj_kernel(qmax):
    inv_qmax = 1.0 / qmax          # Python floats only -> nothing captured as a const

    def kernel(h_ref, w_ref, z_ref):
        h = h_ref[...]                                          # [Tn, Fin]
        hmin = jnp.min(h, axis=1, keepdims=True)
        hmax = jnp.max(h, axis=1, keepdims=True)
        scale = jnp.maximum((hmax - hmin) * inv_qmax, 1e-8)
        qh = jnp.round(jnp.clip((h - hmin) / scale, 0.0, qmax)) * scale + hmin
        # bf16 operands, f32 accumulation on the MXU (all heads in one wide matmul).
        z_ref[...] = jnp.dot(qh.astype(jnp.bfloat16), w_ref[...],
                             preferred_element_type=jnp.float32)

    return kernel


def _make_attn_kernel(num_heads, head_dim, qmax, neg_slope=0.01):
    inv_qmax = 1.0 / qmax

    def kernel(wa_ref, wsum_ref, zsrc_ref, zsrcT_ref, zdst_ref, adj_ref, out_ref):
        # ---- head-invariant, per-tile work (done once, not once per head) ----
        adjf = adj_ref[...].astype(jnp.float32)                 # [Td, N] from int8
        bias = (adjf - 1.0) * 1e30                              # 0 on edges, -1e30 off
        has_edge = jnp.sum(adjf, axis=1, keepdims=True) > 0.0   # [Td, 1]

        for hd in range(num_heads):
            c0 = hd * head_dim
            zsT = zsrcT_ref[c0:c0 + head_dim, :]                # [Dh, N] (features major)
            zd = zdst_ref[:, c0:c0 + head_dim]                  # [Td, Dh]

            # per-node extremes of z (natural layouts; no big relayouts)
            smin = jnp.min(zsT, axis=0, keepdims=True)          # [1, N]
            smax = jnp.max(zsT, axis=0, keepdims=True)
            dmin = jnp.min(zd, axis=1, keepdims=True)           # [Td, 1]
            dmax = jnp.max(zd, axis=1, keepdims=True)

            # per-edge qparams for concat([z_src, z_dst])
            m3 = jnp.minimum(dmin, smin)                        # [Td, N]
            M3 = jnp.maximum(dmax, smax)
            s3 = jnp.maximum((M3 - m3) * inv_qmax, 1e-8)
            inv_s3 = pl.reciprocal(s3, approx=True)             # EUP, no per-edge divides

            # fused quant-code score: never materialize dequantized tensors
            R = None
            for f in range(head_dim):
                zs_f = zsT[f:f + 1, :]                          # [1, N]
                zd_f = zd[:, f:f + 1]                           # [Td, 1]
                r_s = jnp.round(jnp.clip((zs_f - m3) * inv_s3, 0.0, qmax))
                r_d = jnp.round(jnp.clip((zd_f - m3) * inv_s3, 0.0, qmax))
                w_s = wa_ref[(2 * hd + 0) * head_dim + f]       # SMEM scalars
                w_d = wa_ref[(2 * hd + 1) * head_dim + f]
                term = w_s * r_s + w_d * r_d
                R = term if R is None else R + term

            # dequant fixup:  a = s3 * R + m3 * sum(w)
            a = s3 * R + wsum_ref[hd] * m3
            e = jnp.where(a >= 0.0, a, neg_slope * a)           # leaky_relu

            # masked softmax over source nodes (single select via additive bias)
            e_m = e + bias
            e_max = jnp.max(e_m, axis=1, keepdims=True)
            p = jnp.exp(e_m - e_max)                            # masked -> exact 0
            denom = jnp.sum(p, axis=1, keepdims=True)
            alpha = p * pl.reciprocal(denom, approx=True)       # attn dropout: identity

            # aggregation on the MXU (bf16 operands, f32 accumulate)
            zs_h = zsrc_ref[:, c0:c0 + head_dim]                # [N, Dh]
            o = jnp.dot(alpha.astype(jnp.bfloat16), zs_h.astype(jnp.bfloat16),
                        preferred_element_type=jnp.float32)     # [Td, Dh]
            o = jnp.where(has_edge, o, 0.0)                     # in-degree-0 -> zeros
            out_ref[:, c0:c0 + head_dim] = o                    # block store is lane-dense

    return kernel


def multi_head_qgat_forward(h, adj, wfc, wattn, num_bits=8,
                            node_tile=256, dst_tile=256):
    """h: [N, Fin]; adj: [N_dst, N_src] (nonzero iff edge src->dst);
    wfc: [H, Dh, Fin] (torch weight layout); wattn: [H, 1, 2*Dh].
    Returns [N, H*Dh] (merge='cat')."""
    H, Dh, Fin = wfc.shape
    N = h.shape[0]
    HD = H * Dh
    qmax = float(2.0 ** num_bits - 1.0)

    # ---- weight fake-quant (tiny; JAX glue), stacked for one wide matmul ----
    qwfc = _fake_quant_rows(wfc.astype(jnp.float32), qmax)               # [H, Dh, Fin]
    w_all = jnp.transpose(qwfc, (2, 0, 1)).reshape(Fin, HD).astype(jnp.bfloat16)
    qwa = _fake_quant_rows(wattn.astype(jnp.float32), qmax)              # [H, 1, 2*Dh]
    wa_flat = qwa.reshape(H * 2 * Dh).astype(jnp.float32)                # SMEM scalars
    wsum = jnp.sum(qwa, axis=(1, 2)).astype(jnp.float32)                 # [H]

    adj_i8 = (adj != 0).astype(jnp.int8)        # 4x less HBM/VMEM than f32 adjacency

    cparams = pltpu.CompilerParams(
        dimension_semantics=("parallel",),      # megacore sharding over node tiles
        vmem_limit_bytes=48 * 1024 * 1024,      # safe on v5e/v6e (128 MiB) and v7x (64 MiB)
    )

    # ---- kernel A: hoisted input fake-quant + all-heads projection ----------
    tn = _pick_tile(N, node_tile)
    z = pl.pallas_call(
        _make_proj_kernel(qmax),
        out_shape=jax.ShapeDtypeStruct((N, HD), jnp.float32),
        grid=(N // tn,),
        in_specs=[
            pl.BlockSpec((tn, Fin), lambda i: (i, 0)),
            pl.BlockSpec((Fin, HD), lambda i: (0, 0)),
        ],
        out_specs=pl.BlockSpec((tn, HD), lambda i: (i, 0)),
        compiler_params=cparams,
    )(h.astype(jnp.float32), w_all)

    zT = z.T                                    # feature-major view of z for lane-major
                                                # per-source rows inside the attention kernel

    # ---- kernel B: attention + aggregation, tiled over destination nodes ----
    td = _pick_tile(N, dst_tile)
    out = pl.pallas_call(
        _make_attn_kernel(H, Dh, qmax),
        out_shape=jax.ShapeDtypeStruct((N, HD), jnp.float32),
        grid=(N // td,),
        in_specs=[
            pl.BlockSpec(memory_space=pltpu.MemorySpace.SMEM),   # wa_flat  [H*2*Dh]
            pl.BlockSpec(memory_space=pltpu.MemorySpace.SMEM),   # wsum     [H]
            pl.BlockSpec((N, HD), lambda i: (0, 0)),             # z  (all sources, resident)
            pl.BlockSpec((HD, N), lambda i: (0, 0)),             # z^T (resident)
            pl.BlockSpec((td, HD), lambda i: (i, 0)),            # z rows of the dst tile
            pl.BlockSpec((td, N), lambda i: (i, 0)),             # adjacency tile (int8)
        ],
        out_specs=pl.BlockSpec((td, HD), lambda i: (i, 0)),      # lane-dense [N, H*Dh]
        compiler_params=cparams,
    )(wa_flat, wsum, z, zT, z, adj_i8)

    return out                                   # merge == 'cat'


if __name__ == "__main__":
    key = jax.random.PRNGKey(0)
    N, Fin, out_dim, num_heads = 16, 16, 32, 4
    Dh = out_dim // num_heads          # merge='cat' -> each head outputs out_dim // num_heads
    k1, k2, k3 = jax.random.split(key, 3)

    h = jax.random.normal(k1, (N, Fin), dtype=jnp.float32)

    # xavier_normal_ with gain = calculate_gain('relu') = sqrt(2)
    gain = math.sqrt(2.0)
    std_fc = gain * math.sqrt(2.0 / (Fin + Dh))
    std_attn = gain * math.sqrt(2.0 / (2 * Dh + 1))
    wfc = std_fc * jax.random.normal(k2, (num_heads, Dh, Fin), dtype=jnp.float32)
    wattn = std_attn * jax.random.normal(k3, (num_heads, 1, 2 * Dh), dtype=jnp.float32)

    # Deterministic graph: ring + self-loops; adj[i, j] = 1 iff edge j -> i.
    idx = jnp.arange(N)
    adj = ((idx[:, None] == idx[None, :])
           | (idx[:, None] == (idx[None, :] + 1) % N)
           | (idx[:, None] == (idx[None, :] - 1) % N)).astype(jnp.int8)

    out = multi_head_qgat_forward(h, adj, wfc, wattn, num_bits=8)
    out = jax.block_until_ready(out)
    assert out.shape == (N, out_dim) and out.dtype == jnp.float32
    assert bool(jnp.all(jnp.isfinite(out)))
    print("KERNEL_OK")
</pallas_src>

<mosaic_0001>
module attributes {stable_mosaic.version = 11 : i64} {
  func.func @kernel(%arg0: i32, %arg1: memref<16x16xf32, #tpu.memory_space<vmem>>, %arg2: memref<16x32xbf16, #tpu.memory_space<vmem>>, %arg3: memref<16x32xf32, #tpu.memory_space<vmem>>) attributes {dimension_semantics = [#tpu.dimension_semantics<parallel>], iteration_bounds = array<i64: 1>, scalar_prefetch = 0 : i64, scratch_operands = 0 : i64, tpu.core_type = #tpu.core_type<tc>, window_params = [{transform_indices = @transform_0, window_bounds = array<i64: 16, 16>}, {pipeline_mode = #tpu.pipeline_mode<synchronous>, transform_indices = @transform_1, window_bounds = array<i64: 16, 32>}, {transform_indices = @transform_2, window_bounds = array<i64: 16, 32>}]} {
    %c0 = arith.constant 0 : index
    %c0_0 = arith.constant 0 : index
    %0 = vector.load %arg1[%c0, %c0_0] : memref<16x16xf32, #tpu.memory_space<vmem>>, vector<16x16xf32>
    %cst = arith.constant dense<0x7F800000> : vector<16xf32>
    %1 = vector.multi_reduction <minimumf>, %0, %cst [1] : vector<16x16xf32> to vector<16xf32>
    %2 = vector.shape_cast %1 : vector<16xf32> to vector<16x1xf32>
    %cst_1 = arith.constant dense<0xFF800000> : vector<16xf32>
    %3 = vector.multi_reduction <maximumf>, %0, %cst_1 [1] : vector<16x16xf32> to vector<16xf32>
    %4 = vector.shape_cast %3 : vector<16xf32> to vector<16x1xf32>
    %5 = arith.subf %4, %2 : vector<16x1xf32>
    %cst_2 = arith.constant 0.00392156886 : f32
    %6 = vector.broadcast %cst_2 : f32 to vector<16x1xf32>
    %7 = arith.mulf %5, %6 : vector<16x1xf32>
    %cst_3 = arith.constant 9.99999993E-9 : f32
    %8 = vector.broadcast %cst_3 : f32 to vector<16x1xf32>
    %9 = arith.maximumf %7, %8 : vector<16x1xf32>
    %10 = vector.broadcast %2 : vector<16x1xf32> to vector<16x16xf32>
    %11 = arith.subf %0, %10 : vector<16x16xf32>
    %12 = vector.broadcast %9 : vector<16x1xf32> to vector<16x16xf32>
    %13 = arith.divf %11, %12 : vector<16x16xf32>
    %cst_4 = arith.constant 0.000000e+00 : f32
    %cst_5 = arith.constant 2.550000e+02 : f32
    %14 = vector.broadcast %cst_4 : f32 to vector<16x16xf32>
    %15 = arith.maximumf %14, %13 : vector<16x16xf32>
    %16 = vector.broadcast %cst_5 : f32 to vector<16x16xf32>
    %17 = arith.minimumf %16, %15 : vector<16x16xf32>
    %18 = math.roundeven %17 : vector<16x16xf32>
    %19 = vector.broadcast %9 : vector<16x1xf32> to vector<16x16xf32>
    %20 = arith.mulf %18, %19 : vector<16x16xf32>
    %21 = vector.broadcast %2 : vector<16x1xf32> to vector<16x16xf32>
    %22 = arith.addf %20, %21 : vector<16x16xf32>
    %23 = arith.truncf %22 : vector<16x16xf32> to vector<16x16xbf16>
    %c0_6 = arith.constant 0 : index
    %c0_7 = arith.constant 0 : index
    %24 = vector.load %arg2[%c0_6, %c0_7] : memref<16x32xbf16, #tpu.memory_space<vmem>>, vector<16x32xbf16>
    %cst_8 = arith.constant dense<0.000000e+00> : vector<16x32xf32>
    %25 = tpu.matmul %23, %24, %cst_8 {dimension_numbers = #tpu.dot_dimension_numbers<[1], [0], [0], [1], [0, 0, 1, 1], [], []>} : vector<16x16xbf16>, vector<16x32xbf16>, vector<16x32xf32> -> vector<16x32xf32>
    %c0_9 = arith.constant 0 : index
    %c0_10 = arith.constant 0 : index
    %26 = vector.load %arg3[%c0_9, %c0_10] : memref<16x32xf32, #tpu.memory_space<vmem>>, vector<16x32xf32>
    tpu.vector_store %arg3[%c0_9, %c0_10], %25 {strides = array<i32>} : memref<16x32xf32, #tpu.memory_space<vmem>>, vector<16x32xf32>,
    return
  }
  func.func @transform_0(%arg0: i32) -> (i32, i32) {
    %c0_i32 = arith.constant 0 : i32
    %c0_i32_0 = arith.constant 0 : i32
    return %arg0, %c0_i32 : i32, i32
  }
  func.func @transform_1(%arg0: i32) -> (i32, i32) {
    %c0_i32 = arith.constant 0 : i32
    %c0_i32_0 = arith.constant 0 : i32
    %c0_i32_1 = arith.constant 0 : i32
    return %c0_i32, %c0_i32_0 : i32, i32
  }
  func.func @transform_2(%arg0: i32) -> (i32, i32) {
    %c0_i32 = arith.constant 0 : i32
    %c0_i32_0 = arith.constant 0 : i32
    return %arg0, %c0_i32 : i32, i32
  }
}

</mosaic_0001>

<bundles_post_ra>
// kernel: tpu_custom_call.1
= control target key start
LH: loop header
LB: loop body
LE: loop exit
PB: predicated region body
PF: predicated region fallthrough
CT: control target
= control target key end

     0   :  { %7 = vsyncpa [#allocation3], 0  ;;  %s321_s0 = inlined_call_operand.hbm [shape: f32[16,16], index: 0, kind: input, shape index: {}]   ;;  %s322_s1 = inlined_call_operand.hbm [shape: bf16[16,32], index: 1, kind: input, shape index: {}]   ;;  %s323_s2 = inlined_call_operand.hbm [shape: f32[16,32], index: 2, kind: output, shape index: {}]  }
   0x1   :  { %8 = vsyncpa [#allocation6], 0 }
   0x2   :  { %9 = vsyncpa [#allocation4], 0  ;;  %s250_s9 = smov [#allocation2]   ;;  %s178_s13 = scalar_lea.hbm %s321_s0, 256 }
   0x3   :  { %s15_s10 = sshll.u32 %s250_s9, 4  ;;  %p179_p0 = scmp.ne.s32.totalorder %s321_s0, %s178_s13  ;;  %s16_s10 = int_to_ptr.vmem [resolvable:$true] %s15_s10 }
   0x4   :  { %p182_p1 = scmp.lt.u32.totalorder %s178_s13, %s321_s0 }
   0x6   :  { %p184_p2 = pnand %p182_p1, %p179_p0 }
   0x8   :  { %187 = shalt.err (!%p184_p2)
}
   0x9   :  { %s188_s18 = scalar_lea.vmem %s16_s10, 256  ;;  %p193_p4 = scmp.lt.s32.totalorder %s16_s10, %s16_s10 }
   0xa   :  { %p189_p3 = scmp.ne.s32.totalorder %s16_s10, %s188_s18  ;;  %p194_p5 = scmp.lt.s32.totalorder %s188_s18, %s188_s18 }
   0xc   :  { %p195_p6 = por %p194_p5, %p193_p4 }
   0xe   :  { %p196_p7 = pnand %p195_p6, %p189_p3 }
  0x10   :  { %199 = shalt.err (!%p196_p7)
}
  0x11   :  { %s251_s19 = smov 128   ;;  %s252_s20 = smov 8  }
  0x12   :  { %21 = dma.hbm_to_vmem [thread:$0]  %s321_s0, 256, %s16_s10, [#allocation3], %s251_s19, %s251_s19, %s252_s20  }
  0x13   :  { %s253_s23 = smov [#allocation5]   ;;  %s200_s27 = scalar_lea.hbm %s322_s1, 128 }
  0x14   :  { %s27_s24 = sshll.u32 %s253_s23, 4  ;;  %p201_p8 = scmp.ne.s32.totalorder %s322_s1, %s200_s27  ;;  %s28_s24 = int_to_ptr.vmem [resolvable:$true] %s27_s24 }
  0x15   :  { %p204_p9 = scmp.lt.u32.totalorder %s200_s27, %s322_s1 }
  0x17   :  { %p206_p10 = pnand %p204_p9, %p201_p8 }
  0x19   :  { %209 = shalt.err (!%p206_p10)
}
  0x1a   :  { %s210_s4 = scalar_lea.vmem %s28_s24, 128  ;;  %p215_p12 = scmp.lt.s32.totalorder %s28_s24, %s28_s24 }
  0x1b   :  { %p211_p11 = scmp.ne.s32.totalorder %s28_s24, %s210_s4  ;;  %p216_p13 = scmp.lt.s32.totalorder %s210_s4, %s210_s4 }
  0x1d   :  { %p217_p0 = por %p216_p13, %p215_p12 }
  0x1f   :  { %p218_p1 = pnand %p217_p0, %p211_p11 }
  0x21   :  { %221 = shalt.err (!%p218_p1)
}
  0x22   :  { %s254_s0 = smov 64   ;;  %s255_s5 = smov 4  }
  0x23   :  { %33 = dma.hbm_to_vmem [thread:$0]  %s322_s1, 128, %s28_s24, [#allocation6], %s254_s0, %s254_s0, %s255_s5  }
  0x24   :  { %244 = dma.done.wait [#allocation3], 256  }
  0x25   :  { %245 = vsyncadd [#allocation3], 4294967040 }
  0x26   :  { %246 = dma.done.wait [#allocation6], 128  }
  0x27   :  { %247 = vsyncadd [#allocation6], 4294967168  ;;  %vm43_vm0 = vcmask 130048   ;;  %v41_v0 = vld [vmem:[#allocation2] sm:$0xff]  ;;  %v42_v1 = vld [vmem:[#allocation2 + $0x8] sm:$0xff]  ;;  %v256_v7 = vmov 0.0  }
  0x28   :  { %v50_v2 = vsel %vm43_vm0, %v41_v0, -inf  ;;  %v44_v3 = vsel %vm43_vm0, %v41_v0, inf  ;;  %v53_v4 = vsel %vm43_vm0, %v42_v1, -inf  ;;  %v47_v5 = vsel %vm43_vm0, %v42_v1, inf  ;;  %v173_v6 = vld [vmem:[#allocation5] sm:$0xff]   ;;  %156 = vmatprep.subr.bf16.mxu0 %v256_v7  ;;  %s258_s1 = smov [#allocation7]  }
  0x29   :  { %51 = vmax.xlane.f32.xlu1 %v50_v2  ;;  %45 = vmin.xlane.f32.xlu0 %v44_v3  ;;  %vm257_vm1 = vmmov 0   ;;  %vm131_vm2 = vcmask 261120   ;;  %s139_s8 = sshll.u32 %s258_s1, 4  ;;  %s140_s8 = int_to_ptr.vmem [resolvable:$true] %s139_s8 }
  0x2a   :  { %157 = vmatpush3.bf16.msra.mxu0 %v173_v6  ;;  %158 = vmatprep.mubr.msk.bf16.mxu0 %vm257_vm1, %v256_v7  ;;  %s222_s9 = scalar_lea.vmem %s140_s8, 256  ;;  %p227_p3 = scmp.lt.s32.totalorder %s140_s8, %s140_s8 }
  0x2b   :  { %p223_p2 = scmp.ne.s32.totalorder %s140_s8, %s222_s9  ;;  %p228_p4 = scmp.lt.s32.totalorder %s222_s9, %s222_s9 }
  0x2d   :  { %54 = vmax.xlane.f32.xlu1 %v53_v4  ;;  %48 = vmin.xlane.f32.xlu0 %v47_v5  ;;  %p229_p5 = por %p228_p4, %p227_p3 }
  0x2f   :  { %p230_p6 = pnand %p229_p5, %p223_p2 }
  0xb6   :  { %v52_v8 = vpop.xlane.xlu1 %51  ;;  %v46_v9 = vpop.xlane.xlu0 %45 }
  0xb7   :  { %v56_v10 = vsub.f32 %v52_v8, %v46_v9  ;;  %v62_v18 = vsub.f32 %v41_v0, %v46_v9 }
  0xb9   :  { %v58_v11 = vmul.f32 0.003921569, %v56_v10 }
  0xba   :  { %v55_v12 = vpop.xlane.xlu1 %54  ;;  %v49_v13 = vpop.xlane.xlu0 %48 }
  0xbb   :  { %v60_v14 = vmax.f32 %v58_v11, 1e-08  ;;  %v57_v15 = vsub.f32 %v55_v12, %v49_v13  ;;  %v63_v22 = vsub.f32 %v42_v1, %v49_v13 }
  0xbd   :  { %174 = vrcp.f32 %v60_v14  ;;  %v59_v16 = vmul.f32 0.003921569, %v57_v15 }
  0xbf   :  { %v61_v17 = vmax.f32 %v59_v16, 1e-08 }
  0xc1   :  { %176 = vrcp.f32 %v61_v17 }
  0xc7   :  { %v175_v19 = vpop.eup %174 }
  0xc8   :  { %v65_v20 = vmul.f32 %v175_v19, %v62_v18 }
  0xca   :  { %v68_v21 = vmax.f32 %v65_v20, 0.0 }
  0xcb   :  { %v177_v23 = vpop.eup %176 }
  0xcc   :  { %v70_v24 = vmin.f32 %v68_v21, 255.0  ;;  %v67_v25 = vmul.f32 %v177_v23, %v63_v22 }
  0xce   :  { %v162_v26 = vround.rtne.f32 %v70_v24  ;;  %v69_v27 = vmax.f32 %v67_v25, 0.0 }
  0xd0   :  { %v71_v28 = vmin.f32 %v69_v27, 255.0  ;;  %v74_v29 = vmul.f32 %v162_v26, %v60_v14 }
  0xd2   :  { %v163_v30 = vround.rtne.f32 %v71_v28  ;;  %v76_v32 = vadd.f32 %v74_v29, %v46_v9 }
  0xd4   :  { %v75_v31 = vmul.f32 %v163_v30, %v61_v17 }
  0xd6   :  { %v77_v33 = vadd.f32 %v75_v31, %v49_v13 }
  0xd8   :  { %v78_v34 = vpack.c.bf16 %v77_v33, %v76_v32 }
  0xda   :  { %159 = vmatmul.mubr.msk.bf16.vlgmr.msra.gmra.mrb[0].mxu0 %vm43_vm0, %v78_v34 }
 0x1ad   :  { %v124_v35 = vpop.f32.mrb[0].mxu0 }
 0x1ae   :  { %132 = vst.msk [vmem:[#allocation7] sm:$0xff] %vm131_vm2, %v124_v35  ;;  %v160_v36 = vpop.f32.mrb[1].mxu0 }
 0x1af   :  { %v127_v37 = vpop.f32.mrb[2].mxu0 }
 0x1b0   :  { %133 = vst.msk [vmem:[#allocation7 + $0x8] sm:$0xff] %vm131_vm2, %v127_v37  ;;  %v161_v38 = vpop.f32.mrb[3].mxu0 }
 0x1b1   :  { %233 = shalt.err (!%p230_p6)
}
 0x1b2   :  { %s234_s12 = scalar_lea.hbm %s323_s2, 256 }
 0x1b3   :  { %p235_p7 = scmp.ne.s32.totalorder %s323_s2, %s234_s12  ;;  %p238_p8 = scmp.lt.u32.totalorder %s234_s12, %s323_s2 }
 0x1b5   :  { %p240_p9 = pnand %p238_p8, %p235_p7 }
 0x1b7   :  { %243 = shalt.err (!%p240_p9)
}
 0x1b8   :  { %145 = dma.vmem_to_hbm [thread:$0]  %s140_s8, 256, %s323_s2, [#allocation4], %s251_s19, %s251_s19, %s252_s20  }
 0x1b9   :  { %248 = dma.done.wait [#allocation4], 256  }
 0x1ba   :  { %249 = vsyncadd [#allocation4], 4294967040 }
 0x1bb   :  { %149 = vsyncpa [#allocation3], 1 }
 0x1bc   :  { %150 = vsyncpa [#allocation6], 1 }
 0x1bd   :  { %151 = vsyncpa [#allocation4], 1 }

</bundles_post_ra>
